<compile_context>
chip_gen: v5e
topology: v5e:2x2
jax: 0.10.0
libtpu: 0.0.40
codegen_flags: <defaults>
</compile_context>

<pallas_src>
import functools

import jax
import jax.numpy as jnp
from jax.experimental import pallas as pl
from jax.experimental.pallas import tpu as pltpu

_LANE = 128
_DEFAULT_SLAB_TARGET = 4 * 1024 * 1024     # target bytes for one x tile
_VMEM_FLOOR = 32 * 1024 * 1024             # safe scoped-VMEM request on v5e/v6e/v7x


def _round_up(a, b):
    return (a + b - 1) // b * b


def _largest_divisor(n, ok):
    best = 1
    for d in range(1, n + 1):
        if n % d == 0 and ok(d):
            best = d
    return best


def _vmem_limit(footprint_bytes):
    return int(max(_VMEM_FLOOR, footprint_bytes + 4 * 1024 * 1024))


# --------------------------- fused single-pass kernel ---------------------------
def _fused_kernel(x_ref, wt_ref, b_ref, o_ref, *, inv_hw):
    # x_ref/o_ref: (Bt, C, HW); wt_ref: (C, C) = weight.T; b_ref: (1, C) f32
    xv = x_ref[...]
    pooled = jnp.sum(xv.astype(jnp.float32), axis=-1) * inv_hw               # (Bt, C)
    y = jnp.dot(pooled, wt_ref[...].astype(jnp.float32),
                preferred_element_type=jnp.float32) + b_ref[...]             # (Bt, C)
    attn = jax.nn.sigmoid(y)                                                 # (Bt, C)
    o_ref[...] = xv * attn[:, :, None].astype(o_ref.dtype)   # multiply in input dtype


# ------------------------------ two-pass kernels --------------------------------
def _pool_attn_kernel(x_ref, wt_ref, b_ref, attn_ref, acc_ref, *, inv_hw):
    # x_ref: (Bt, C, hw_t); wt_ref: (C, C) = weight.T; b_ref: (1, C) f32
    # attn_ref: (1, Bt, C) f32 output (lane-dense); acc_ref: (Bt, C) f32 scratch
    k = pl.program_id(1)

    @pl.when(k == 0)
    def _():
        acc_ref[...] = jnp.zeros_like(acc_ref)

    acc_ref[...] += jnp.sum(x_ref[...].astype(jnp.float32), axis=-1)         # (Bt, C)

    @pl.when(k == pl.num_programs(1) - 1)
    def _():
        pooled = acc_ref[...] * inv_hw                                       # (Bt, C)
        y = jnp.dot(pooled, wt_ref[...].astype(jnp.float32),
                    preferred_element_type=jnp.float32) + b_ref[...]         # (Bt, C)
        attn_ref[0] = jax.nn.sigmoid(y)


def _scale_kernel(x_ref, a_ref, o_ref):
    # x_ref/o_ref: (Bt, C, hw_t); a_ref: (Bt, C, 1) f32
    o_ref[...] = x_ref[...] * a_ref[...].astype(o_ref.dtype)


# ---------------------------------- wrapper --------------------------------------
def channel_attention(x, weight, bias, *, slab_target_bytes=_DEFAULT_SLAB_TARGET,
                      force_two_pass=False):
    """x: (N, C, H, W); weight: (C, C) [out_ch, in_ch]; bias: (C,) -> (N, C, H, W)."""
    N, C, H, W = x.shape
    HW = H * W
    x_item = x.dtype.itemsize
    w_item = weight.dtype.itemsize
    inv_hw = float(1.0 / HW)

    x3 = x.reshape(N, C, HW)
    wt = weight.T                                       # (in, out) for (Bt,C)@(C,C)
    b_row = bias.reshape(1, C).astype(jnp.float32)

    # Spatial (lane) handling: keep stores lane-dense; pad only when we must tile HW.
    if HW % _LANE == 0 or C * HW * x_item <= slab_target_bytes:
        hw_p = HW                               # aligned, or small enough for full-extent
    else:                                       # big & misaligned: pad so HW can be tiled
        hw_p = _round_up(HW, _LANE)
        x3 = jnp.pad(x3, ((0, 0), (0, 0), (0, hw_p - HW)))

    if hw_p % _LANE == 0:
        m = hw_p // _LANE
        d = _largest_divisor(m, lambda d: C * d * _LANE * x_item <= slab_target_bytes)
        hw_t = d * _LANE
    else:
        hw_t = hw_p                             # full-extent block (always legal)

    elem_slab = C * hw_p * x_item
    use_fused = (not force_two_pass) and N >= 2 and elem_slab <= slab_target_bytes

    if use_fused:
        # Pack batch elements per step (amortize ~0.35us/step) but keep >= 2 grid
        # steps so both v7x TensorCores are fed.
        bt = _largest_divisor(
            N, lambda d: d * elem_slab <= slab_target_bytes and (N // d) >= 2)
        fp = 4 * bt * elem_slab + 2 * (C * C * w_item + C * 4)
        out3 = pl.pallas_call(
            functools.partial(_fused_kernel, inv_hw=inv_hw),
            out_shape=jax.ShapeDtypeStruct((N, C, hw_p), x.dtype),
            grid_spec=pltpu.PrefetchScalarGridSpec(
                num_scalar_prefetch=0,
                grid=(N // bt,),
                in_specs=[
                    pl.BlockSpec((bt, C, hw_p), lambda i: (i, 0, 0)),
                    pl.BlockSpec((C, C), lambda i: (0, 0)),
                    pl.BlockSpec((1, C), lambda i: (0, 0)),
                ],
                out_specs=pl.BlockSpec((bt, C, hw_p), lambda i: (i, 0, 0)),
            ),
            compiler_params=pltpu.CompilerParams(
                dimension_semantics=("parallel",),
                vmem_limit_bytes=_vmem_limit(fp)),
        )(x3, wt, b_row)
    else:
        # ----- pass 1: pooled sums + 1x1 conv + sigmoid -> lane-dense attention -----
        bt = _largest_divisor(N, lambda d: d * C * hw_t * x_item <= slab_target_bytes)
        nb, nk = N // bt, hw_p // hw_t
        fp1 = (2 * bt * C * hw_t * x_item            # double-buffered x tiles
               + 3 * bt * C * 4                      # attn out (x2) + f32 accumulator
               + 2 * (C * C * w_item + C * 4))       # weight.T + bias
        attn_rows = pl.pallas_call(
            functools.partial(_pool_attn_kernel, inv_hw=inv_hw),
            out_shape=jax.ShapeDtypeStruct((nb, bt, C), jnp.float32),
            grid_spec=pltpu.PrefetchScalarGridSpec(
                num_scalar_prefetch=0,
                grid=(nb, nk),                       # reduction (HW) axis last
                in_specs=[
                    pl.BlockSpec((bt, C, hw_t), lambda i, k: (i, 0, k)),
                    pl.BlockSpec((C, C), lambda i, k: (0, 0)),
                    pl.BlockSpec((1, C), lambda i, k: (0, 0)),
                ],
                out_specs=pl.BlockSpec((1, bt, C), lambda i, k: (i, 0, 0)),
                scratch_shapes=[pltpu.VMEM((bt, C), jnp.float32)],
            ),
            compiler_params=pltpu.CompilerParams(
                dimension_semantics=("parallel", "arbitrary"),
                vmem_limit_bytes=_vmem_limit(fp1)),
        )(x3, wt, b_row)

        # Tiny relayout (N, C) -> (N, C, 1) done by XLA outside the kernels.
        attn_col = attn_rows.reshape(N, C, 1)

        # ----- pass 2: broadcast multiply, fully parallel, lane-dense output tiles -----
        fp2 = 4 * bt * C * hw_t * x_item + 2 * bt * C * 4
        out3 = pl.pallas_call(
            _scale_kernel,
            out_shape=jax.ShapeDtypeStruct((N, C, hw_p), x.dtype),
            grid_spec=pltpu.PrefetchScalarGridSpec(
                num_scalar_prefetch=0,
                grid=(nb, nk),
                in_specs=[
                    pl.BlockSpec((bt, C, hw_t), lambda i, k: (i, 0, k)),
                    pl.BlockSpec((bt, C, 1), lambda i, k: (i, 0, 0)),
                ],
                out_specs=pl.BlockSpec((bt, C, hw_t), lambda i, k: (i, 0, k)),
            ),
            compiler_params=pltpu.CompilerParams(
                dimension_semantics=("parallel", "parallel"),
                vmem_limit_bytes=_vmem_limit(fp2)),
        )(x3, attn_col)

    if hw_p != HW:
        out3 = out3[:, :, :HW]
    return out3.reshape(N, C, H, W)


# ----------------------------------- tests ---------------------------------------
def _reference(x, weight, bias):
    pooled = jnp.mean(x, axis=(2, 3))                       # (N, C)
    attn = jax.nn.sigmoid(pooled @ weight.T + bias)         # (N, C)
    return x * attn[:, :, None, None]


if __name__ == "__main__":
    key = jax.random.PRNGKey(0)
    kx, kw, kb = jax.random.split(key, 3)

    # Primary case: N=2, C=4, 16x16 spatial (exercises the fused path).
    N, C, H, W = 2, 4, 16, 16
    x = jax.random.normal(kx, (N, C, H, W), dtype=jnp.float32)
    weight = jax.random.normal(kw, (C, C), dtype=jnp.float32) * 0.1
    bias = jax.random.normal(kb, (C,), dtype=jnp.float32) * 0.1
    ref = _reference(x, weight, bias)

    out = channel_attention(x, weight, bias)
    jax.block_until_ready(out)
    assert jnp.allclose(out, ref, atol=1e-5, rtol=1e-5), "fused path mismatch"

    out2 = channel_attention(x, weight, bias, force_two_pass=True)
    jax.block_until_ready(out2)
    assert jnp.allclose(out2, ref, atol=1e-5, rtol=1e-5), "two-pass path mismatch"

    # N=1 with non-128-aligned spatial (full-extent blocks, two-pass path).
    x1 = jax.random.normal(kx, (1, 8, 10, 10), dtype=jnp.float32)
    w1 = jax.random.normal(kw, (8, 8), dtype=jnp.float32) * 0.1
    b1 = jax.random.normal(kb, (8,), dtype=jnp.float32) * 0.1
    o1 = channel_attention(x1, w1, b1)
    jax.block_until_ready(o1)
    assert jnp.allclose(o1, _reference(x1, w1, b1), atol=1e-5, rtol=1e-5), "N=1 mismatch"

    # Force the padded / HW-tiled branch with a tiny slab budget.
    o2 = channel_attention(x1, w1, b1, slab_target_bytes=1024)
    jax.block_until_ready(o2)
    assert jnp.allclose(o2, _reference(x1, w1, b1), atol=1e-5, rtol=1e-5), "padded mismatch"

    print("KERNEL_OK")
</pallas_src>

<mosaic_0001>
module attributes {stable_mosaic.version = 11 : i64} {
  func.func @_fused_kernel(%arg0: i32, %arg1: memref<1x4x256xf32, #tpu.memory_space<vmem>>, %arg2: memref<4x4xf32, #tpu.memory_space<vmem>>, %arg3: memref<1x4xf32, #tpu.memory_space<vmem>>, %arg4: memref<1x4x256xf32, #tpu.memory_space<vmem>>) attributes {dimension_semantics = [#tpu.dimension_semantics<parallel>], iteration_bounds = array<i64: 2>, scalar_prefetch = 0 : i64, scratch_operands = 0 : i64, tpu.core_type = #tpu.core_type<tc>, window_params = [{transform_indices = @transform_0, window_bounds = array<i64: 1, 4, 256>}, {pipeline_mode = #tpu.pipeline_mode<synchronous>, transform_indices = @transform_1, window_bounds = array<i64: 4, 4>}, {pipeline_mode = #tpu.pipeline_mode<synchronous>, transform_indices = @transform_2, window_bounds = array<i64: 1, 4>}, {transform_indices = @transform_3, window_bounds = array<i64: 1, 4, 256>}]} {
    %c0 = arith.constant 0 : index
    %c0_0 = arith.constant 0 : index
    %c0_1 = arith.constant 0 : index
    %0 = vector.load %arg1[%c0, %c0_0, %c0_1] : memref<1x4x256xf32, #tpu.memory_space<vmem>>, vector<1x4x256xf32>
    %cst = arith.constant dense<0.000000e+00> : vector<1x4xf32>
    %1 = vector.multi_reduction <add>, %0, %cst [2] : vector<1x4x256xf32> to vector<1x4xf32>
    %cst_2 = arith.constant 3.906250e-03 : f32
    %2 = vector.broadcast %cst_2 : f32 to vector<1x4xf32>
    %3 = arith.mulf %1, %2 : vector<1x4xf32>
    %c0_3 = arith.constant 0 : index
    %c0_4 = arith.constant 0 : index
    %4 = vector.load %arg2[%c0_3, %c0_4] : memref<4x4xf32, #tpu.memory_space<vmem>>, vector<4x4xf32>
    %cst_5 = arith.constant dense<0.000000e+00> : vector<1x4xf32>
    %5 = tpu.matmul %3, %4, %cst_5 {dimension_numbers = #tpu.dot_dimension_numbers<[1], [0], [0], [1], [0, 0, 1, 1], [], []>} : vector<1x4xf32>, vector<4x4xf32>, vector<1x4xf32> -> vector<1x4xf32>
    %c0_6 = arith.constant 0 : index
    %c0_7 = arith.constant 0 : index
    %6 = vector.load %arg3[%c0_6, %c0_7] : memref<1x4xf32, #tpu.memory_space<vmem>>, vector<1x4xf32>
    %7 = arith.addf %5, %6 : vector<1x4xf32>
    %8 = arith.negf %7 : vector<1x4xf32>
    %9 = math.exp %8 : vector<1x4xf32>
    %cst_8 = arith.constant 1.000000e+00 : f32
    %10 = vector.broadcast %cst_8 : f32 to vector<1x4xf32>
    %11 = arith.addf %10, %9 : vector<1x4xf32>
    %12 = arith.divf %10, %11 : vector<1x4xf32>
    %13 = vector.shape_cast %12 : vector<1x4xf32> to vector<1x4x1xf32>
    %14 = vector.broadcast %13 : vector<1x4x1xf32> to vector<1x4x256xf32>
    %15 = arith.mulf %0, %14 : vector<1x4x256xf32>
    %c0_9 = arith.constant 0 : index
    %c0_10 = arith.constant 0 : index
    %c0_11 = arith.constant 0 : index
    %16 = vector.load %arg4[%c0_9, %c0_10, %c0_11] : memref<1x4x256xf32, #tpu.memory_space<vmem>>, vector<1x4x256xf32>
    tpu.vector_store %arg4[%c0_9, %c0_10, %c0_11], %15 {strides = array<i32>} : memref<1x4x256xf32, #tpu.memory_space<vmem>>, vector<1x4x256xf32>,
    return
  }
  func.func @transform_0(%arg0: i32) -> (i32, i32, i32) {
    %c0_i32 = arith.constant 0 : i32
    %c0_i32_0 = arith.constant 0 : i32
    %c0_i32_1 = arith.constant 0 : i32
    return %arg0, %c0_i32, %c0_i32_0 : i32, i32, i32
  }
  func.func @transform_1(%arg0: i32) -> (i32, i32) {
    %c0_i32 = arith.constant 0 : i32
    %c0_i32_0 = arith.constant 0 : i32
    %c0_i32_1 = arith.constant 0 : i32
    return %c0_i32, %c0_i32_0 : i32, i32
  }
  func.func @transform_2(%arg0: i32) -> (i32, i32) {
    %c0_i32 = arith.constant 0 : i32
    %c0_i32_0 = arith.constant 0 : i32
    %c0_i32_1 = arith.constant 0 : i32
    return %c0_i32, %c0_i32_0 : i32, i32
  }
  func.func @transform_3(%arg0: i32) -> (i32, i32, i32) {
    %c0_i32 = arith.constant 0 : i32
    %c0_i32_0 = arith.constant 0 : i32
    %c0_i32_1 = arith.constant 0 : i32
    return %arg0, %c0_i32, %c0_i32_0 : i32, i32, i32
  }
}

</mosaic_0001>

<bundles_post_ra>
// kernel: tpu_custom_call.1
= control target key start
LH: loop header
LB: loop body
LE: loop exit
PB: predicated region body
PF: predicated region fallthrough
CT: control target
= control target key end

     0   :  { %8 = vsyncpa [#allocation3], 0  ;;  %s764_s0 = inlined_call_operand.hbm [shape: f32[2,4,256], index: 0, kind: input, shape index: {}]   ;;  %s765_s1 = inlined_call_operand.hbm [shape: f32[4,4], index: 1, kind: input, shape index: {}]   ;;  %s766_s2 = inlined_call_operand.vmem [shape: f32[1,4], index: 2, kind: input, shape index: {}]   ;;  %s767_s3 = inlined_call_operand.hbm [shape: f32[2,4,256], index: 3, kind: output, shape index: {}]  }
   0x1   :  { %10 = vsyncpa [#allocation3 + $0x1], 0 }
   0x2   :  { %11 = vsyncpa [#allocation6], 0 }
   0x3   :  { %12 = vsyncpa [#allocation4], 0 }
   0x4   :  { %14 = vsyncpa [#allocation4 + $0x1], 0  ;;  %s619_s12 = smov 0   ;;  %s621_s13 = smov 0  }
   0x5   :  { %s623_s14 = smov 0   ;;  %s625_s15 = smov 0  }
   0x6 LB: > { %s640_s16 = sadd.s32 4294967295, %s595_s15   ;;  %s381_s17 = sadd.s32 4294967294, %s595_s15   ;;  %s595_s15 = sphi %s625_s15, %s777_s15   ;;  %s591_s14 = sphi %s623_s14, %s776_s14   ;;  %s587_s13 = sphi %s621_s13, %s775_s13   ;;  %s583_s12 = sphi %s619_s12, %s774_s12  }
   0x7   : > { %p40_p0 = scmp.ne.s32.totalorder %s587_s13, %s583_s12  ;;  %p41_p1 = scmp.eq.s32.totalorder %s640_s16, 0 }
   0x8   : > { %p106_p2 = scmp.eq.s32.totalorder %s640_s16, 1  ;;  %p112_p3 = scmp.eq.s32.totalorder %s381_s17, 1 }
   0x9   : > { %p649_p4 = por %p41_p1, %p40_p0  ;;  %p382_p5 = scmp.ge.s32.totalorder %s595_s15, 1 }
   0xa   : > { %p654_p6 = por %p112_p3, %p40_p0  ;;  %p119_p7 = scmp.lt.s32.totalorder %s595_s15, 3 }
   0xb   : > { %s131_s22 = sshll.u32 %s765_s1, 4  ;;  %s597_s24 = smov [#allocation5]   ;;  %s132_s22 = int_to_ptr.hbm [resolvable:$true] %s131_s22 }
   0xc   : > { %p662_p8 = pnand %p382_p5, %p119_p7  ;;  %s133_s25 = sshll.u32 %s597_s24, 4  ;;  %s134_s25 = int_to_ptr.vmem [resolvable:$true] %s133_s25 }
   0xd   : > { %s672_s26 = sadd.s32 1, %s595_s15   ;;  %s27_s27 = sadd.s32 1, %s591_s14 }
   0xe   : > { %p410_p10 = pneg %p662_p8  ;;  %s24_s28 = ssub.s32 %s595_s15, %s672_s26 }
   0xf   : > { %p25_p12 = scmp.eq.s32.totalorder %s24_s28, 0  ;;  %p34_p13 = scmp.ne.s32.totalorder %s591_s14, %s587_s13 }
  0x10   : > { %p411_p11 = pnand %p410_p10, %p41_p1  ;;  %p35_p0 = scmp.eq.s32.totalorder %s595_s15, 0 }
  0x11   : > { %s681_s29 = scalar_select %p25_p12, %s591_s14, %s27_s27  }
  0x12   : > { %413 = dma.hbm_to_vmem [thread:$0]  (!%p411_p11), %s132_s22, 64, %s134_s25, [#allocation6]  }
  0x13   : > { %p685_p3 = por %p106_p2, %p34_p13  ;;  %p423_p5 = scmp.lt.s32.totalorder %s595_s15, 2 }
  0x14   : > { %s147_s4 = sand.u32 1, %s591_s14   ;;  %s400_s5 = sshll.u32 %s595_s15, 3 }
  0x15   : > { %p36_p7 = por %p35_p0, %p34_p13  ;;  %s385_s6 = sshll.u32 %s147_s4, 3 }
  0x16   : > { %s156_s9 = scalar_lea.hbm %s764_s0, %s400_s5  ;;  %s151_s11 = scalar_lea.vmem [#allocation2], %s385_s6 }
  0x17   : > { %s158_s10 = sshll.u32 %s156_s9, 4  ;;  %s160_s17 = sshll.u32 %s151_s11, 4  ;;  %s159_s10 = int_to_ptr.hbm [resolvable:$true] %s158_s10  ;;  %s161_s17 = int_to_ptr.vmem [resolvable:$true] %s160_s17 }
  0x18   : > { %p695_p10 = pnand %p423_p5, %p36_p7  ;;  %s148_s21 = scalar_lea.sflag [#allocation3], %s147_s4 }
  0x19   : > { %s495_s22 = sshra.s32 %s159_s10, 4  ;;  %s502_s28 = scalar_lea.hbm %s764_s0, 16  ;;  %s496_s22 = int_to_ptr.hbm [resolvable:$true] %s495_s22 }
  0x1a   : > { %s497_s24 = scalar_lea.hbm %s496_s22, 8  ;;  %p499_p11 = pneg %p695_p10 }
  0x1b   : > { %p498_p2 = scmp.ne.s32.totalorder %s496_s22, %s497_s24  ;;  %p503_p0 = scmp.lt.s32.totalorder %s496_s22, %s764_s0 }
  0x1c   : > { %p504_p5 = scmp.lt.s32.totalorder %s502_s28, %s497_s24 }
  0x1d   : > { %p500_p12 = pnand %p499_p11, %p498_p2 }
  0x1e   : > { %p505_p7 = por %p504_p5, %p503_p0 }
  0x1f   : > { %p501_p13 = pneg %p500_p12 }
  0x21   : > { %p506_p9 = pnand %p505_p7, %p501_p13 }
  0x23   : > { %509 = shalt.err (!%p506_p9)
}
  0x24   : > { %417 = dma.hbm_to_vmem [thread:$0]  (!%p695_p10), %s159_s10, 128, %s161_s17, %s148_s21  }
  0x25   : > { %169 = sbr.rel (%p662_p8) target bundleno = 457 (0x1c9), region = 32  ;;  %s712_s4 = sand.u32 (!%p662_p8), 1, %s587_s13  }
  0x26   : > { %s389_s7 = sshll.u32 (!%p662_p8), %s712_s4, 3  ;;  %s172_s8 = scalar_lea.sflag (!%p662_p8), [#allocation3], %s712_s4 }
  0x27   : > { %s175_s9 = scalar_lea.vmem (!%p662_p8), [#allocation2], %s389_s7 }
  0x2a   : > { %570 = dma.done.wait (%p649_p4), %s172_s8, 128  }
  0x2b   : > { %572 = vsyncadd (%p649_p4), %s172_s8, 4294967168 }
  0x2c   : > { %574 = dma.done.wait (%p41_p1), [#allocation6], 64  }
  0x2d   : > { %576 = vsyncadd (%p41_p1), [#allocation6], 4294967232  ;;  %v204_v0 = vld [vmem:[%s175_s9] sm:$0xff]  ;;  %vm211_vm0 = vcmask 1043456   ;;  %v218_v6 = vld [vmem:[#allocation5] sm:$0xf]  ;;  %v221_v7 = vlaneseq }
  0x2e   : > { %206 = vst [vmem:[#allocation1] ss:$2 sm:$0xff] %v204_v0  ;;  %392 = vmatpush.msk.msra.mxu0 %vm211_vm0, %v218_v6  ;;  %vm224_vm1 = vcmask 31744   ;;  %v219_v13 = vld [vmem:[%s766_s2] sm:$0x1]  ;;  %s401_s10 = sshll.u32 %s640_s16, 3 }
  0x2f   : > { %v222_v8 = vand.u32 127, %v221_v7  ;;  %v271_v12 = vshrl.u32 %v221_v7, 7  ;;  %v598_v30 = vmov 839922192   ;;  %s296_s20 = scalar_lea.hbm %s767_s3, %s401_s10  ;;  %s203_s21 = scalar_lea.vmem [#allocation7], %s389_s7 }
  0x30   : > { %v278_v31 = vunpack.c.l.s4 %v598_v30  ;;  %s298_s22 = sshll.u32 %s203_s21, 4  ;;  %s300_s24 = sshll.u32 %s296_s20, 4  ;;  %s299_s22 = int_to_ptr.vmem [resolvable:$true] %s298_s22  ;;  %s301_s24 = int_to_ptr.hbm [resolvable:$true] %s300_s24 }
  0x31   : > { %460 = vset.pattern.permute.xlu0 %v271_v12  ;;  %s285_s25 = scalar_lea.sflag [#allocation4], %s712_s4  ;;  %s539_s27 = sshra.s32 %s301_s24, 4  ;;  %s540_s27 = int_to_ptr.hbm [resolvable:$true] %s539_s27 }
  0x32   : > { %v279_v32 = vunpack.c.0.s8 %v278_v31  ;;  %s541_s16 = scalar_lea.hbm %s540_s27, 8  ;;  %s545_s6 = scalar_lea.hbm %s767_s3, 16 }
  0x33   : > { %p542_p1 = scmp.ne.s32.totalorder %s540_s27, %s541_s16  ;;  %p546_p9 = scmp.lt.s32.totalorder %s540_s27, %s767_s3 }
  0x34   : > { %p547_p10 = scmp.lt.s32.totalorder %s545_s6, %s541_s16 }
  0x35   : > { %v207_v1 = vld.sshfl [vmem:[#allocation1] sm:$0xff pattern:$0x75316420]  ;;  %v208_v2 = vld.sshfl [vmem:[#allocation1 + $0x8] sm:$0xff pattern:$0x75316420]  ;;  %p543_p4 = pnand %p542_p1, %p685_p3 }
  0x36   : > { %v212_v3 = vsel %vm211_vm0, %v207_v1, 0.0  ;;  %v213_v4 = vsel %vm211_vm0, %v208_v2, 0.0  ;;  %p548_p2 = por %p547_p10, %p546_p9 }
  0x37   : > { %v214_v5 = vadd.f32 %v213_v4, %v212_v3  ;;  %p544_p8 = pneg %p543_p4 }
  0x39   : > { %215 = vadd.xlane.f32.xlu0 %v214_v5  ;;  %p549_p11 = pnand %p548_p2, %p544_p8 }
  0xac   : > { %v216_v9 = vpop.xlane.xlu0 %215 }
  0xad   : > { %v217_v10 = vmul.f32 0.00390625, %v216_v9 }
  0xaf   : > { %v223_v11 = vperm.slane %v217_v10, %v222_v8 }
  0xb1   : > { %393 = vmatmul.msk.f32.vlgmr.msra.gmra.mxu0 %vm224_vm1, %v223_v11 }
 0x12e   : > { %v247_v14 = vpop.f32.mrf.mxu0 }
 0x12f   : > { %v248_v15 = vadd.f32 %v247_v14, %v219_v13 }
 0x131   : > { %v394_v16 = vmul.f32 -1.442695, %v248_v15 }
 0x133   : > { %461 = vpow2.f32 %v394_v16 }
 0x139   : > { %v462_v17 = vpop.eup %461 }
 0x13a   : > { %v253_v18 = vadd.f32 1.0, %v462_v17 }
 0x13c   : > { %463 = vrcp.f32 %v253_v18  ;;  %v265_v22 = vand.u32 2147483648, %v253_v18  ;;  %v263_v24 = vand.u32 2147483647, %v253_v18  ;;  %vm259_vm3 = vweird.f32 %v253_v18 }
 0x13e   : > { %v266_v26 = vor.u32 1.1754944e-38, %v265_v22  ;;  %vm264_vm5 = vcmp.eq.f32.partialorder %v263_v24, 8.507059e+37 }
 0x142   : > { %v464_v19 = vpop.eup %463 }
 0x143   : > { %v255_v20 = vmul.f32 %v464_v19, %v253_v18  ;;  %vm260_vm2 = vweird.f32 %v464_v19 }
 0x144   : > { %vm261_vm4 = vmor %vm259_vm3, %vm260_vm2 }
 0x145   : > { %v256_v21 = vsub.f32 1.0, %v255_v20 }
 0x147   : > { %v257_v23 = vmul.f32 %v464_v19, %v256_v21 }
 0x149   : > { %v258_v25 = vadd.f32 %v464_v19, %v257_v23 }
 0x14b   : > { %v262_v27 = vsel %vm261_vm4, %v464_v19, %v258_v25 }
 0x14c   : > { %v267_v28 = vsel %vm264_vm5, %v266_v26, %v262_v27 }
 0x14d   : > { %v269_v29 = vperm.slane %v267_v28, 0 }
 0x14f   : > { %274 = vperm.xlu0 %460, %v269_v29  }
 0x1c1   : > { %v275_v33 = vpop.permute.xlu0 %274 }
 0x1c2   : > { %v280_v34 = vperm.slane %v275_v33, %v279_v32 }
 0x1c4   : > { %v282_v35 = vmul.f32 %v280_v34, %v204_v0 }
 0x1c6   : > { %283 = vst [vmem:[%s203_s21] sm:$0xff] %v282_v35 }
 0x1c7   : > { %552 = shalt.err (!%p549_p11)
}
 0x1c8   : > { %408 = dma.vmem_to_hbm [thread:$0]  (%p685_p3), %s299_s22, 128, %s301_s24, %s285_s25  }
 0x1c9 PF: > { %s312_s4 = sand.u32 1, %s583_s12   ;;  %p773_p12 = scmp.ge.s32.totalorder %s595_s15, 2 }
 0x1ca   : > { %s313_s9 = scalar_lea.sflag [#allocation4], %s312_s4 }
 0x1cb   : > { %p419_p13 = pnand %p773_p12, %p654_p6 }
 0x1cd   : > { %p420_p0 = pneg %p419_p13 }
 0x1cf   : > { %578 = dma.done.wait (%p420_p0), %s313_s9, 128  }
 0x1d0   : > { %580 = vsyncadd (%p420_p0), %s313_s9, 4294967168  ;;  %p17_p5 = scmp.ge.s32.totalorder %s672_s26, 4   ;;  %s774_s12 = smov %s587_s13 }
 0x1d1   : > { %s775_s13 = smov %s591_s14  ;;  %s776_s14 = smov %s681_s29 }
 0x1d2   : > { %s777_s15 = smov %s672_s26  ;;  %19 = sbr.rel (!%p17_p5) target bundleno = 6 (0x6), region = 81 }
 0x1d7   :  { %319 = vsyncpa [#allocation3], 1 }
 0x1d8   :  { %321 = vsyncpa [#allocation3 + $0x1], 1 }
 0x1d9   :  { %322 = vsyncpa [#allocation6], 1 }
 0x1da   :  { %323 = vsyncpa [#allocation4], 1 }
 0x1db   :  { %325 = vsyncpa [#allocation4 + $0x1], 1 }

</bundles_post_ra>
